<compile_context>
chip_gen: v5e
topology: v5e:2x2
jax: 0.10.0
libtpu: 0.0.40
codegen_flags: <defaults>
</compile_context>

<pallas_src>
import jax
import jax.numpy as jnp
from jax.experimental import pallas as pl
from jax.experimental.pallas import tpu as pltpu

FC1 = FC2 = FC3 = 20
INPUT_DIM, OUTPUT_DIM = 3, 1

HID_PAD = 32      # hidden width 20 -> 32 (sublane aligned; padded rows stay exactly 0)
W4_ROW_PAD = 8    # fc4 output rows padded 1 -> 8 for an aligned MXU result tile

LANE = 128
MAX_TILE_B = 4096  # batch tile on the lane axis; sweep 2048-8192 if tuning further


def _round_up(x, m):
    return (x + m - 1) // m * m


def mlp_kernel(x_ref,
               w1_ref, b1_ref,
               w2_ref, b2_ref,
               w3_ref, b3_ref,
               w4_ref, b4_ref,
               o_ref):
    # x_ref: (INPUT_DIM, tile_b) feature-major; batch sits on the 128-lane axis.
    x = x_ref[...]

    # Layer 1 (contraction length 3): rank-1 broadcasts on the VPU. The MXU would
    # be <1% utilized at K=3, and this keeps every matmul shape trivially aligned.
    h = (b1_ref[...]
         + w1_ref[:, 0:1] * x[0:1, :]
         + w1_ref[:, 1:2] * x[1:2, :]
         + w1_ref[:, 2:3] * x[2:3, :])
    h = jnp.maximum(h, 0.0)

    h = jnp.dot(w2_ref[...], h, preferred_element_type=jnp.float32) + b2_ref[...]
    h = jnp.maximum(h, 0.0)

    h = jnp.dot(w3_ref[...], h, preferred_element_type=jnp.float32) + b3_ref[...]
    h = jnp.maximum(h, 0.0)

    out = jnp.dot(w4_ref[...], h, preferred_element_type=jnp.float32)  # (8, tile_b)
    o_ref[...] = (out[:OUTPUT_DIM, :] + b4_ref[...]).astype(o_ref.dtype)


def init_linear(key, fan_in, fan_out):
    # PyTorch nn.Linear default init: U(-1/sqrt(fan_in), 1/sqrt(fan_in)).
    kw, kb = jax.random.split(key)
    bound = 1.0 / (fan_in ** 0.5)
    w = jax.random.uniform(kw, (fan_out, fan_in), jnp.float32, -bound, bound)  # (out, in)
    b = jax.random.uniform(kb, (fan_out,), jnp.float32, -bound, bound)
    return w, b


def pack_params(params):
    """Zero-pad (out, in) weights / (out,) biases once to TPU-friendly shapes."""
    (w1, b1), (w2, b2), (w3, b3), (w4, b4) = params

    def pad_w(w, rows, cols):
        return jnp.zeros((rows, cols), jnp.float32).at[:w.shape[0], :w.shape[1]].set(w)

    def pad_b(b, rows):
        return jnp.zeros((rows, 1), jnp.float32).at[:b.shape[0], 0].set(b)

    w1p = pad_w(w1, HID_PAD, INPUT_DIM)    # (32, 3)   K kept unpadded (VPU layer)
    b1p = pad_b(b1, HID_PAD)               # (32, 1)
    w2p = pad_w(w2, HID_PAD, HID_PAD)      # (32, 32)
    b2p = pad_b(b2, HID_PAD)
    w3p = pad_w(w3, HID_PAD, HID_PAD)      # (32, 32)
    b3p = pad_b(b3, HID_PAD)
    w4p = pad_w(w4, W4_ROW_PAD, HID_PAD)   # (8, 32)   only row 0 is real
    b4p = pad_b(b4, OUTPUT_DIM)            # (1, 1)
    return (w1p, b1p, w2p, b2p, w3p, b3p, w4p, b4p)


@jax.jit
def net_forward(x, packed_params):
    """x: (batch, INPUT_DIM) f32. Returns (batch, OUTPUT_DIM) f32."""
    w1, b1, w2, b2, w3, b3, w4, b4 = packed_params
    n = x.shape[0]

    n_pad = _round_up(max(n, 1), LANE)
    # Aim for >=2 grid steps when the batch allows (keeps both v7x TCs busy),
    # capped at MAX_TILE_B; the last block may be ragged (Pallas masks it).
    tile_b = max(LANE, min(MAX_TILE_B, _round_up(pl.cdiv(n_pad, 2), LANE)))
    grid = (pl.cdiv(n_pad, tile_b),)

    # Feature-major (3, n_pad) slab -- only real feature rows travel through HBM.
    # Under jit this transpose/pad fuses with neighboring ops.
    x_t = jnp.zeros((INPUT_DIM, n_pad), jnp.float32).at[:, :n].set(x.T)

    def batch_map(i):
        return (0, i)

    def const_map(i):
        return (0, 0)

    weights = (w1, b1, w2, b2, w3, b3, w4, b4)
    weight_specs = [pl.BlockSpec(w.shape, const_map) for w in weights]

    flops = 2 * n_pad * (INPUT_DIM * HID_PAD + 2 * HID_PAD * HID_PAD
                         + HID_PAD * OUTPUT_DIM)
    bytes_accessed = 4 * ((INPUT_DIM + OUTPUT_DIM) * n_pad
                          + HID_PAD * INPUT_DIM + 2 * HID_PAD * HID_PAD
                          + W4_ROW_PAD * HID_PAD + 3 * HID_PAD + OUTPUT_DIM)

    out_t = pl.pallas_call(
        mlp_kernel,
        out_shape=jax.ShapeDtypeStruct((OUTPUT_DIM, n_pad), jnp.float32),
        grid=grid,
        in_specs=[pl.BlockSpec((INPUT_DIM, tile_b), batch_map)] + weight_specs,
        out_specs=pl.BlockSpec((OUTPUT_DIM, tile_b), batch_map),
        compiler_params=pltpu.CompilerParams(
            dimension_semantics=("parallel",),      # shard batch tiles across v7x's 2 TCs
            vmem_limit_bytes=32 * 1024 * 1024,      # safe on v5e/v6e/v7x; usage is <2 MiB
        ),
        cost_estimate=pl.CostEstimate(
            flops=flops, transcendentals=0, bytes_accessed=bytes_accessed),
    )(x_t, *weights)

    # Back to PyTorch's (batch, output_dim) layout (fused under jit).
    return out_t[:OUTPUT_DIM, :n].T


def reference_forward(x, params):
    (w1, b1), (w2, b2), (w3, b3), (w4, b4) = params
    h = jnp.maximum(x @ w1.T + b1, 0.0)
    h = jnp.maximum(h @ w2.T + b2, 0.0)
    h = jnp.maximum(h @ w3.T + b3, 0.0)
    return h @ w4.T + b4


if __name__ == "__main__":
    key = jax.random.PRNGKey(0)
    k_x, k1, k2, k3, k4 = jax.random.split(key, 5)

    batch = 8
    x = jax.random.normal(k_x, (batch, INPUT_DIM), jnp.float32)

    params = (
        init_linear(k1, INPUT_DIM, FC1),
        init_linear(k2, FC1, FC2),
        init_linear(k3, FC2, FC3),
        init_linear(k4, FC3, OUTPUT_DIM),
    )
    packed = pack_params(params)

    out = jax.block_until_ready(net_forward(x, packed))
    ref = reference_forward(x, params)

    assert out.shape == (batch, OUTPUT_DIM)
    assert jnp.allclose(out, ref, atol=1e-5, rtol=1e-5)

    print("KERNEL_OK")
</pallas_src>

<mosaic_0001>
module attributes {stable_mosaic.version = 11 : i64} {
  func.func @mlp_kernel(%arg0: i32, %arg1: memref<3x128xf32, #tpu.memory_space<vmem>>, %arg2: memref<32x3xf32, #tpu.memory_space<vmem>>, %arg3: memref<32x1xf32, #tpu.memory_space<vmem>>, %arg4: memref<32x32xf32, #tpu.memory_space<vmem>>, %arg5: memref<32x1xf32, #tpu.memory_space<vmem>>, %arg6: memref<32x32xf32, #tpu.memory_space<vmem>>, %arg7: memref<32x1xf32, #tpu.memory_space<vmem>>, %arg8: memref<8x32xf32, #tpu.memory_space<vmem>>, %arg9: memref<1x1xf32, #tpu.memory_space<vmem>>, %arg10: memref<1x128xf32, #tpu.memory_space<vmem>>) attributes {dimension_semantics = [#tpu.dimension_semantics<parallel>], iteration_bounds = array<i64: 1>, scalar_prefetch = 0 : i64, scratch_operands = 0 : i64, tpu.core_type = #tpu.core_type<tc>, window_params = [{transform_indices = @transform_0, window_bounds = array<i64: 3, 128>}, {pipeline_mode = #tpu.pipeline_mode<synchronous>, transform_indices = @transform_1, window_bounds = array<i64: 32, 3>}, {pipeline_mode = #tpu.pipeline_mode<synchronous>, transform_indices = @transform_2, window_bounds = array<i64: 32, 1>}, {pipeline_mode = #tpu.pipeline_mode<synchronous>, transform_indices = @transform_3, window_bounds = array<i64: 32, 32>}, {pipeline_mode = #tpu.pipeline_mode<synchronous>, transform_indices = @transform_4, window_bounds = array<i64: 32, 1>}, {pipeline_mode = #tpu.pipeline_mode<synchronous>, transform_indices = @transform_5, window_bounds = array<i64: 32, 32>}, {pipeline_mode = #tpu.pipeline_mode<synchronous>, transform_indices = @transform_6, window_bounds = array<i64: 32, 1>}, {pipeline_mode = #tpu.pipeline_mode<synchronous>, transform_indices = @transform_7, window_bounds = array<i64: 8, 32>}, {pipeline_mode = #tpu.pipeline_mode<synchronous>, transform_indices = @transform_8, window_bounds = array<i64: 1, 1>}, {transform_indices = @transform_9, window_bounds = array<i64: 1, 128>}]} {
    %c0 = arith.constant 0 : index
    %c0_0 = arith.constant 0 : index
    %0 = vector.load %arg1[%c0, %c0_0] : memref<3x128xf32, #tpu.memory_space<vmem>>, vector<3x128xf32>
    %c0_1 = arith.constant 0 : index
    %c0_2 = arith.constant 0 : index
    %1 = vector.load %arg3[%c0_1, %c0_2] : memref<32x1xf32, #tpu.memory_space<vmem>>, vector<32x1xf32>
    %c0_3 = arith.constant 0 : index
    %c0_4 = arith.constant 0 : index
    %2 = vector.load %arg2[%c0_3, %c0_4] : memref<32x3xf32, #tpu.memory_space<vmem>>, vector<32x1xf32>
    %3 = vector.extract_strided_slice %0 {offsets = [0, 0], sizes = [1, 128], strides = [1, 1]} : vector<3x128xf32> to vector<1x128xf32>
    %4 = vector.broadcast %2 : vector<32x1xf32> to vector<32x128xf32>
    %5 = vector.broadcast %3 : vector<1x128xf32> to vector<32x128xf32>
    %6 = arith.mulf %4, %5 : vector<32x128xf32>
    %7 = vector.broadcast %1 : vector<32x1xf32> to vector<32x128xf32>
    %8 = arith.addf %7, %6 : vector<32x128xf32>
    %c0_5 = arith.constant 0 : index
    %c1 = arith.constant 1 : index
    %9 = vector.load %arg2[%c0_5, %c1] : memref<32x3xf32, #tpu.memory_space<vmem>>, vector<32x1xf32>
    %10 = vector.extract_strided_slice %0 {offsets = [1, 0], sizes = [1, 128], strides = [1, 1]} : vector<3x128xf32> to vector<1x128xf32>
    %11 = vector.broadcast %9 : vector<32x1xf32> to vector<32x128xf32>
    %12 = vector.broadcast %10 : vector<1x128xf32> to vector<32x128xf32>
    %13 = arith.mulf %11, %12 : vector<32x128xf32>
    %14 = arith.addf %8, %13 : vector<32x128xf32>
    %c0_6 = arith.constant 0 : index
    %c2 = arith.constant 2 : index
    %15 = vector.load %arg2[%c0_6, %c2] : memref<32x3xf32, #tpu.memory_space<vmem>>, vector<32x1xf32>
    %16 = vector.extract_strided_slice %0 {offsets = [2, 0], sizes = [1, 128], strides = [1, 1]} : vector<3x128xf32> to vector<1x128xf32>
    %17 = vector.broadcast %15 : vector<32x1xf32> to vector<32x128xf32>
    %18 = vector.broadcast %16 : vector<1x128xf32> to vector<32x128xf32>
    %19 = arith.mulf %17, %18 : vector<32x128xf32>
    %20 = arith.addf %14, %19 : vector<32x128xf32>
    %cst = arith.constant 0.000000e+00 : f32
    %21 = vector.broadcast %cst : f32 to vector<32x128xf32>
    %22 = arith.maximumf %20, %21 : vector<32x128xf32>
    %c0_7 = arith.constant 0 : index
    %c0_8 = arith.constant 0 : index
    %23 = vector.load %arg4[%c0_7, %c0_8] : memref<32x32xf32, #tpu.memory_space<vmem>>, vector<32x32xf32>
    %cst_9 = arith.constant dense<0.000000e+00> : vector<32x128xf32>
    %24 = tpu.matmul %23, %22, %cst_9 {dimension_numbers = #tpu.dot_dimension_numbers<[1], [0], [0], [1], [0, 0, 1, 1], [], []>} : vector<32x32xf32>, vector<32x128xf32>, vector<32x128xf32> -> vector<32x128xf32>
    %c0_10 = arith.constant 0 : index
    %c0_11 = arith.constant 0 : index
    %25 = vector.load %arg5[%c0_10, %c0_11] : memref<32x1xf32, #tpu.memory_space<vmem>>, vector<32x1xf32>
    %26 = vector.broadcast %25 : vector<32x1xf32> to vector<32x128xf32>
    %27 = arith.addf %24, %26 : vector<32x128xf32>
    %cst_12 = arith.constant 0.000000e+00 : f32
    %28 = vector.broadcast %cst_12 : f32 to vector<32x128xf32>
    %29 = arith.maximumf %27, %28 : vector<32x128xf32>
    %c0_13 = arith.constant 0 : index
    %c0_14 = arith.constant 0 : index
    %30 = vector.load %arg6[%c0_13, %c0_14] : memref<32x32xf32, #tpu.memory_space<vmem>>, vector<32x32xf32>
    %cst_15 = arith.constant dense<0.000000e+00> : vector<32x128xf32>
    %31 = tpu.matmul %30, %29, %cst_15 {dimension_numbers = #tpu.dot_dimension_numbers<[1], [0], [0], [1], [0, 0, 1, 1], [], []>} : vector<32x32xf32>, vector<32x128xf32>, vector<32x128xf32> -> vector<32x128xf32>
    %c0_16 = arith.constant 0 : index
    %c0_17 = arith.constant 0 : index
    %32 = vector.load %arg7[%c0_16, %c0_17] : memref<32x1xf32, #tpu.memory_space<vmem>>, vector<32x1xf32>
    %33 = vector.broadcast %32 : vector<32x1xf32> to vector<32x128xf32>
    %34 = arith.addf %31, %33 : vector<32x128xf32>
    %cst_18 = arith.constant 0.000000e+00 : f32
    %35 = vector.broadcast %cst_18 : f32 to vector<32x128xf32>
    %36 = arith.maximumf %34, %35 : vector<32x128xf32>
    %c0_19 = arith.constant 0 : index
    %c0_20 = arith.constant 0 : index
    %37 = vector.load %arg8[%c0_19, %c0_20] : memref<8x32xf32, #tpu.memory_space<vmem>>, vector<8x32xf32>
    %cst_21 = arith.constant dense<0.000000e+00> : vector<8x128xf32>
    %38 = tpu.matmul %37, %36, %cst_21 {dimension_numbers = #tpu.dot_dimension_numbers<[1], [0], [0], [1], [0, 0, 1, 1], [], []>} : vector<8x32xf32>, vector<32x128xf32>, vector<8x128xf32> -> vector<8x128xf32>
    %39 = vector.extract_strided_slice %38 {offsets = [0, 0], sizes = [1, 128], strides = [1, 1]} : vector<8x128xf32> to vector<1x128xf32>
    %c0_22 = arith.constant 0 : index
    %c0_23 = arith.constant 0 : index
    %40 = vector.load %arg9[%c0_22, %c0_23] : memref<1x1xf32, #tpu.memory_space<vmem>>, vector<1x1xf32>
    %41 = vector.broadcast %40 : vector<1x1xf32> to vector<1x128xf32>
    %42 = arith.addf %39, %41 : vector<1x128xf32>
    %c0_24 = arith.constant 0 : index
    %c0_25 = arith.constant 0 : index
    %43 = vector.load %arg10[%c0_24, %c0_25] : memref<1x128xf32, #tpu.memory_space<vmem>>, vector<1x128xf32>
    tpu.vector_store %arg10[%c0_24, %c0_25], %42 {strides = array<i32>} : memref<1x128xf32, #tpu.memory_space<vmem>>, vector<1x128xf32>,
    return
  }
  func.func @transform_0(%arg0: i32) -> (i32, i32) {
    %c0_i32 = arith.constant 0 : i32
    %c0_i32_0 = arith.constant 0 : i32
    return %c0_i32, %arg0 : i32, i32
  }
  func.func @transform_1(%arg0: i32) -> (i32, i32) {
    %c0_i32 = arith.constant 0 : i32
    %c0_i32_0 = arith.constant 0 : i32
    %c0_i32_1 = arith.constant 0 : i32
    return %c0_i32, %c0_i32_0 : i32, i32
  }
  func.func @transform_2(%arg0: i32) -> (i32, i32) {
    %c0_i32 = arith.constant 0 : i32
    %c0_i32_0 = arith.constant 0 : i32
    %c0_i32_1 = arith.constant 0 : i32
    return %c0_i32, %c0_i32_0 : i32, i32
  }
  func.func @transform_3(%arg0: i32) -> (i32, i32) {
    %c0_i32 = arith.constant 0 : i32
    %c0_i32_0 = arith.constant 0 : i32
    %c0_i32_1 = arith.constant 0 : i32
    return %c0_i32, %c0_i32_0 : i32, i32
  }
  func.func @transform_4(%arg0: i32) -> (i32, i32) {
    %c0_i32 = arith.constant 0 : i32
    %c0_i32_0 = arith.constant 0 : i32
    %c0_i32_1 = arith.constant 0 : i32
    return %c0_i32, %c0_i32_0 : i32, i32
  }
  func.func @transform_5(%arg0: i32) -> (i32, i32) {
    %c0_i32 = arith.constant 0 : i32
    %c0_i32_0 = arith.constant 0 : i32
    %c0_i32_1 = arith.constant 0 : i32
    return %c0_i32, %c0_i32_0 : i32, i32
  }
  func.func @transform_6(%arg0: i32) -> (i32, i32) {
    %c0_i32 = arith.constant 0 : i32
    %c0_i32_0 = arith.constant 0 : i32
    %c0_i32_1 = arith.constant 0 : i32
    return %c0_i32, %c0_i32_0 : i32, i32
  }
  func.func @transform_7(%arg0: i32) -> (i32, i32) {
    %c0_i32 = arith.constant 0 : i32
    %c0_i32_0 = arith.constant 0 : i32
    %c0_i32_1 = arith.constant 0 : i32
    return %c0_i32, %c0_i32_0 : i32, i32
  }
  func.func @transform_8(%arg0: i32) -> (i32, i32) {
    %c0_i32 = arith.constant 0 : i32
    %c0_i32_0 = arith.constant 0 : i32
    %c0_i32_1 = arith.constant 0 : i32
    return %c0_i32, %c0_i32_0 : i32, i32
  }
  func.func @transform_9(%arg0: i32) -> (i32, i32) {
    %c0_i32 = arith.constant 0 : i32
    %c0_i32_0 = arith.constant 0 : i32
    return %c0_i32, %arg0 : i32, i32
  }
}

</mosaic_0001>

<bundles_post_ra>
// kernel: net_forward.1
= control target key start
LH: loop header
LB: loop body
LE: loop exit
PB: predicated region body
PF: predicated region fallthrough
CT: control target
= control target key end

     0   :  { %v364_v0 = vmov 0   ;;  %v365_v6 = vmov 1   ;;  %v366_v8 = vmov 2   ;;  %vm174_vm0 = vcmask 261120   ;;  %s510_s2 = inlined_call_operand.vmem [shape: f32[32,1], index: 2, kind: input, shape index: {}]   ;;  %s511_s1 = inlined_call_operand.vmem [shape: f32[32,3], index: 1, kind: input, shape index: {}]   ;;  %s512_s0 = inlined_call_operand.vmem [shape: f32[3,128], index: 0, kind: input, shape index: {}]   ;;  %s513_s4 = inlined_call_operand.vmem [shape: f32[32,1], index: 4, kind: input, shape index: {}]   ;;  %s514_s8 = inlined_call_operand.<no memory space> [shape: f32[1,1], index: 8, kind: input, shape index: {}]   ;;  %s515_s6 = inlined_call_operand.vmem [shape: f32[32,1], index: 6, kind: input, shape index: {}]   ;;  %s516_s3 = inlined_call_operand.vmem [shape: f32[32,32], index: 3, kind: input, shape index: {}]   ;;  %s517_s5 = inlined_call_operand.vmem [shape: f32[32,32], index: 5, kind: input, shape index: {}]   ;;  %s518_s7 = inlined_call_operand.vmem [shape: f32[8,32], index: 7, kind: input, shape index: {}]   ;;  %s519_s9 = inlined_call_operand.vmem [shape: f32[1,128], index: 9, kind: output, shape index: {}]  }
   0x1   :  { %351 = vset.pattern.permute.xlu1 %v364_v0  ;;  %350 = vset.pattern.permute.xlu0 %v364_v0  ;;  %v38_v1 = vld [vmem:[%s510_s2 + $0x18] sm:$0xff]  ;;  %v40_v3 = vld [vmem:[%s511_s1 + $0x8] sm:$0xff]  ;;  %v41_v4 = vld [vmem:[%s511_s1 + $0x10] sm:$0xff]  ;;  %v14_v47 = vstv %s514_s8 }
   0x2   :  { %v42_v2 = vld [vmem:[%s511_s1 + $0x18] sm:$0xff]  ;;  %85 = vperm.xlu1 %351, %v38_v1   ;;  %353 = vset.pattern.permute.xlu2 %v364_v0  ;;  %v37_v5 = vld [vmem:[%s510_s2 + $0x10] sm:$0xff]  ;;  %v39_v7 = vld [vmem:[%s511_s1] sm:$0xff]  ;;  %15 = vst [vmem:[#allocation2] sm:$0x1] %v14_v47 }
   0x3   :  { %60 = vperm.xlu0 %350, %v42_v2   ;;  %50 = vperm.xlu2 %353, %v40_v3   ;;  %v36_v9 = vld [vmem:[%s510_s2 + $0x8] sm:$0xff]  ;;  %v35_v10 = vld [vmem:[%s510_s2] sm:$0xff]  ;;  %v152_v41 = vld [vmem:[%s513_s4 + $0x10] sm:$0xff] }
   0x4   :  { %v34_v15 = vld [vmem:[%s512_s0] sm:$0x7]  ;;  %v153_v45 = vld [vmem:[%s513_s4 + $0x18] sm:$0xff]  ;;  %v151_v50 = vld [vmem:[%s513_s4 + $0x8] sm:$0xff] }
   0x5   :  { %v63_v17 = vperm.slane %v34_v15, 0  ;;  %v108_v19 = vperm.slane %v34_v15, 1  ;;  %v133_v23 = vperm.slane %v34_v15, 2  ;;  %v150_v46 = vld [vmem:[%s513_s4] sm:$0xff]  ;;  %v226_v58 = vld [vmem:[%s515_s6 + $0x10] sm:$0xff]  ;;  %v225_v59 = vld [vmem:[%s515_s6 + $0x8] sm:$0xff] }
   0x6   :  { %v227_v62 = vld [vmem:[%s515_s6 + $0x18] sm:$0xff] }
   0xa   :  { %352 = vset.pattern.permute.xlu1 %v365_v6 }
   0xb   :  { %55 = vperm.xlu0 %350, %v41_v4   ;;  %105 = vperm.xlu1 %352, %v42_v2  }
   0xc   :  { %80 = vperm.xlu2 %353, %v37_v5   ;;  %v317_v5 = vld [vmem:[#allocation2] sm:$0x1] }
  0x13   :  { %354 = vset.pattern.permute.xlu0 %v365_v6  ;;  %355 = vset.pattern.permute.xlu1 %v366_v8 }
  0x14   :  { %101 = vperm.xlu0 %354, %v41_v4   ;;  %130 = vperm.xlu1 %355, %v42_v2  }
  0x15   :  { %45 = vperm.xlu2 %353, %v39_v7  }
  0x1c   :  { %358 = vset.pattern.permute.xlu0 %v366_v8  ;;  %356 = vset.pattern.permute.xlu1 %v364_v0 }
  0x1d   :  { %126 = vperm.xlu0 %358, %v41_v4   ;;  %75 = vperm.xlu1 %356, %v36_v9   ;;  %v146_v4 = vld [vmem:[%s516_s3] sm:$0xff] }
  0x1e   :  { %357 = vset.pattern.permute.xlu2 %v365_v6  ;;  %v224_v6 = vld [vmem:[%s515_s6] sm:$0xff] }
  0x1f   :  { %97 = vperm.xlu2 %357, %v40_v3  }
  0x25   :  { %361 = vset.pattern.permute.xlu0 %v364_v0  ;;  %70 = vperm.xlu1 %356, %v35_v10  }
  0x26   :  { %171 = vperm.xlu0 %361, %v153_v45   ;;  %v293_v45 = vld [vmem:[%s518_s7] sm:$0xff] }
  0x27   :  { %93 = vperm.xlu2 %357, %v39_v7  }
  0x2d   :  { %359 = vset.pattern.permute.xlu1 %v366_v8 }
  0x2e   :  { %122 = vperm.xlu1 %359, %v40_v3   ;;  %240 = vperm.xlu0 %361, %v226_v58   ;;  %v147_v3 = vld [vmem:[%s516_s3 + $0x8] sm:$0xff] }
  0x2f   :  { %360 = vset.pattern.permute.xlu2 %v366_v8  ;;  %v149_v8 = vld [vmem:[%s516_s3 + $0x18] sm:$0xff] }
  0x30   :  { %118 = vperm.xlu2 %360, %v39_v7   ;;  %v148_v7 = vld [vmem:[%s516_s3 + $0x10] sm:$0xff] }
  0x36   :  { %362 = vset.pattern.permute.xlu1 %v364_v0  ;;  %320 = vperm.xlu0 %361, %v317_v5  }
  0x37   :  { %166 = vperm.xlu1 %362, %v152_v41  }
  0x38   :  { %363 = vset.pattern.permute.xlu2 %v364_v0 }
  0x39   :  { %161 = vperm.xlu2 %363, %v151_v50  }
  0x3f   :  { %156 = vperm.xlu1 %362, %v150_v46  }
  0x41   :  { %245 = vperm.xlu2 %363, %v227_v62  }
  0x47   :  { %235 = vperm.xlu1 %362, %v225_v59  }
  0x49   :  { %230 = vperm.xlu2 %363, %v224_v6  }
  0x5d   :  { %v51_v11 = vpop.permute.xlu2 %50 }
  0x5e   :  { %v65_v48 = vmul.f32 %v63_v17, %v51_v11 }
  0x66   :  { %v81_v14 = vpop.permute.xlu2 %80 }
  0x6f   :  { %v46_v20 = vpop.permute.xlu2 %45 }
  0x70   :  { %v64_v44 = vmul.f32 %v63_v17, %v46_v20 }
  0x74   :  { %v86_v12 = vpop.permute.xlu1 %85 }
  0x75   :  { %v61_v13 = vpop.permute.xlu0 %60 }
  0x76   :  { %v67_v21 = vmul.f32 %v63_v17, %v61_v13 }
  0x78   :  { %v91_v24 = vadd.f32 %v86_v12, %v67_v21 }
  0x79   :  { %v98_v29 = vpop.permute.xlu2 %97 }
  0x7a   :  { %v110_v52 = vmul.f32 %v108_v19, %v98_v29 }
  0x7d   :  { %v56_v16 = vpop.permute.xlu0 %55  ;;  %v106_v18 = vpop.permute.xlu1 %105 }
  0x7e   :  { %v112_v22 = vmul.f32 %v108_v19, %v106_v18  ;;  %v66_v30 = vmul.f32 %v63_v17, %v56_v16 }
  0x80   :  { %v116_v27 = vadd.f32 %v112_v22, %v91_v24  ;;  %v90_v34 = vadd.f32 %v81_v14, %v66_v30 }
  0x81   :  { %v94_v40 = vpop.permute.xlu2 %93 }
  0x82   :  { %v109_v54 = vmul.f32 %v108_v19, %v94_v40 }
  0x86   :  { %v102_v25 = vpop.permute.xlu0 %101  ;;  %v131_v26 = vpop.permute.xlu1 %130 }
  0x87   :  { %v137_v28 = vmul.f32 %v133_v23, %v131_v26  ;;  %v111_v32 = vmul.f32 %v108_v19, %v102_v25  ;;  %v220_v25 = vld [vmem:[%s517_s5] sm:$0xff]  ;;  %v221_v26 = vld [vmem:[%s517_s5 + $0x8] sm:$0xff] }
  0x89   :  { %v141_v31 = vadd.f32 %v137_v28, %v116_v27  ;;  %v115_v36 = vadd.f32 %v111_v32, %v90_v34  ;;  %v222_v27 = vld [vmem:[%s517_s5 + $0x10] sm:$0xff]  ;;  %v223_v28 = vld [vmem:[%s517_s5 + $0x18] sm:$0xff] }
  0x8a   :  { %v119_v51 = vpop.permute.xlu2 %118 }
  0x8b   :  { %v145_v33 = vmax.f32 %v141_v31, 0.0  ;;  %v134_v56 = vmul.f32 %v133_v23, %v119_v51 }
  0x8d   :  { %199 = vmatpush.msra.mxu0 %v145_v33  ;;  %339 = vmatpush.msra.mxu3 %v145_v33 }
  0x8f   :  { %v127_v35 = vpop.permute.xlu0 %126  ;;  %v76_v38 = vpop.permute.xlu1 %75 }
  0x90   :  { %v136_v37 = vmul.f32 %v133_v23, %v127_v35  ;;  %v89_v53 = vadd.f32 %v76_v38, %v65_v48 }
  0x92   :  { %v140_v39 = vadd.f32 %v136_v37, %v115_v36  ;;  %v114_v60 = vadd.f32 %v110_v52, %v89_v53 }
  0x93   :  { %v162_v12 = vpop.permute.xlu2 %161 }
  0x94   :  { %v144_v42 = vmax.f32 %v140_v39, 0.0 }
  0x96   :  { %200 = vmatpush.msra.mxu0 %v144_v42  ;;  %340 = vmatpush.msra.mxu3 %v144_v42 }
  0x97   :  { %v71_v43 = vpop.permute.xlu1 %70 }
  0x98   :  { %v88_v49 = vadd.f32 %v71_v43, %v64_v44  ;;  %v172_v13 = vpop.permute.xlu0 %171 }
  0x9a   :  { %v113_v55 = vadd.f32 %v109_v54, %v88_v49 }
  0x9b   :  { %v246_v31 = vpop.permute.xlu2 %245 }
  0x9c   :  { %v138_v0 = vadd.f32 %v134_v56, %v113_v55 }
  0x9e   :  { %v142_v2 = vmax.f32 %v138_v0, 0.0 }
  0xa0   :  { %v123_v57 = vpop.permute.xlu1 %122  ;;  %v241_v32 = vpop.permute.xlu0 %240 }
  0xa1   :  { %v135_v61 = vmul.f32 %v133_v23, %v123_v57 }
  0xa3   :  { %v139_v63 = vadd.f32 %v135_v61, %v114_v60  ;;  %v231_v40 = vpop.permute.xlu2 %230 }
  0xa5   :  { %v143_v1 = vmax.f32 %v139_v63, 0.0 }
  0xa7   :  { %201 = vmatpush.msra.mxu0 %v143_v1  ;;  %341 = vmatpush.msra.mxu3 %v143_v1 }
  0xa8   :  { %v321_v46 = vpop.permute.xlu0 %320 }
  0xa9   :  { %202 = vmatpush.msra.mxu0 %v142_v2  ;;  %342 = vmatpush.msra.mxu3 %v142_v2  ;;  %v167_v11 = vpop.permute.xlu1 %166  ;;  %v323_v47 = vperm.slane %v321_v46, 0 }
  0xaa   :  { %331 = vmatmul.msk.f32.vlgmr.msra.gmra.mxu3 %vm174_vm0, %v147_v3  ;;  %330 = vmatmul.msk.f32.vlgmr.msra.gmra.mxu0 %vm174_vm0, %v146_v4 }
  0xb1   :  { %v157_v20 = vpop.permute.xlu1 %156 }
  0xb2   :  { %332 = vmatmul.msk.f32.gmra.mxu3 %vm174_vm0, %v148_v7 }
  0xb9   :  { %v236_v36 = vpop.permute.xlu1 %235 }
  0xba   :  { %333 = vmatmul.msk.f32.gmra.mxu3 %vm174_vm0, %v149_v8 }
 0x127   :  { %v204_v17 = vpop.f32.mrf.mxu0 }
 0x128   :  { %v205_v22 = vadd.f32 %v204_v17, %v157_v20 }
 0x12a   :  { %v216_v24 = vmax.f32 %v205_v22, 0.0 }
 0x12d   :  { %v207_v9 = vpop.f32.mrf.mxu3 }
 0x12e   :  { %v208_v18 = vadd.f32 %v207_v9, %v162_v12 }
 0x130   :  { %v217_v23 = vmax.f32 %v208_v18, 0.0 }
 0x135   :  { %v210_v10 = vpop.f32.mrf.mxu3 }
 0x136   :  { %v211_v15 = vadd.f32 %v210_v10, %v167_v11 }
 0x138   :  { %v218_v21 = vmax.f32 %v211_v15, 0.0 }
 0x13d   :  { %v213_v14 = vpop.f32.mrf.mxu3 }
 0x13e   :  { %v214_v16 = vadd.f32 %v213_v14, %v172_v13 }
 0x140   :  { %v219_v19 = vmax.f32 %v214_v16, 0.0 }
 0x142   :  { %272 = vmatpush.msrb.mxu0 %v219_v19  ;;  %343 = vmatpush.msra.mxu1 %v219_v19 }
 0x144   :  { %273 = vmatpush.msrb.mxu0 %v218_v21  ;;  %344 = vmatpush.msra.mxu1 %v218_v21 }
 0x146   :  { %274 = vmatpush.msrb.mxu0 %v217_v23  ;;  %345 = vmatpush.msra.mxu1 %v217_v23 }
 0x148   :  { %275 = vmatpush.msrb.mxu0 %v216_v24  ;;  %346 = vmatpush.msra.mxu1 %v216_v24 }
 0x149   :  { %334 = vmatmul.msk.f32.vlgmr.msrb.gmra.mxu0 %vm174_vm0, %v220_v25  ;;  %335 = vmatmul.msk.f32.vlgmr.msra.gmra.mxu1 %vm174_vm0, %v221_v26 }
 0x151   :  { %336 = vmatmul.msk.f32.gmra.mxu1 %vm174_vm0, %v222_v27 }
 0x159   :  { %337 = vmatmul.msk.f32.gmra.mxu1 %vm174_vm0, %v223_v28 }
 0x1c6   :  { %v280_v29 = vpop.f32.mrf.mxu1  ;;  %v277_v37 = vpop.f32.mrf.mxu0 }
 0x1c7   :  { %v281_v38 = vadd.f32 %v280_v29, %v236_v36  ;;  %v278_v41 = vadd.f32 %v277_v37, %v231_v40 }
 0x1c9   :  { %v290_v43 = vmax.f32 %v281_v38, 0.0  ;;  %v289_v44 = vmax.f32 %v278_v41, 0.0 }
 0x1ce   :  { %v283_v30 = vpop.f32.mrf.mxu1 }
 0x1cf   :  { %v284_v34 = vadd.f32 %v283_v30, %v241_v32 }
 0x1d1   :  { %v291_v42 = vmax.f32 %v284_v34, 0.0 }
 0x1d6   :  { %v286_v33 = vpop.f32.mrf.mxu1 }
 0x1d7   :  { %v287_v35 = vadd.f32 %v286_v33, %v246_v31 }
 0x1d9   :  { %v292_v39 = vmax.f32 %v287_v35, 0.0 }
 0x1db   :  { %309 = vmatpush.msra.mxu2 %v292_v39 }
 0x1dd   :  { %310 = vmatpush.msra.mxu2 %v291_v42 }
 0x1df   :  { %311 = vmatpush.msra.mxu2 %v290_v43 }
 0x1e1   :  { %312 = vmatpush.msra.mxu2 %v289_v44 }
 0x1e2   :  { %338 = vmatmul.msk.f32.vlgmr.msra.gmra.mxu2 %vm174_vm0, %v293_v45 }
 0x265   :  { %v314_v48 = vpop.f32.mrf.mxu2 }
 0x266   :  { %v324_v49 = vadd.f32 %v323_v47, %v314_v48 }
 0x268   :  { %325 = vst [vmem:[%s519_s9] sm:$0x1] %v324_v49 }

</bundles_post_ra>
